<compile_context>
chip_gen: v7x
topology: tpu7x:2x2x1
jax: 0.10.0
libtpu: 0.0.40
codegen_flags: <defaults>
</compile_context>

<pallas_src>
import jax
import jax.numpy as jnp
from jax.experimental import pallas as pl
from jax.experimental.pallas import tpu as pltpu

LANE = 128


def _round_up(n, m):
    return ((n + m - 1) // m) * m


def mlp_kernel(x_ref, w1_ref, s1_ref, b1_ref, w2_ref, s2_ref, b2_ref,
               w3_ref, s3_ref, b3_ref, o_ref, xp_ref):
    """Single-shot fused quantized MLP; everything resident in VMEM."""
    d_in = x_ref.shape[1]

    # Fold pad(784 -> 896) + f32->bf16 cast into the kernel: zero the
    # lane-padded scratch once, then write the real columns into it.
    xp_ref[...] = jnp.zeros_like(xp_ref)
    xp_ref[:, :d_in] = x_ref[...].astype(jnp.bfloat16)
    x = xp_ref[...]                                            # (B, D_pad) bf16

    # fc1 + relu1: int8 -> bf16 is exact; scale the dot RESULT, not the weights
    # (mathematically identical for per-output-channel scales).
    h1 = jnp.dot(x, w1_ref[...].astype(jnp.bfloat16),
                 preferred_element_type=jnp.float32)           # (B, H1) f32
    h1 = jnp.maximum(h1 * s1_ref[...] + b1_ref[...], 0.0)      # f32 epilogue
    h1 = h1.astype(jnp.bfloat16)                               # one cast for next MXU op

    # fc2 + relu2
    h2 = jnp.dot(h1, w2_ref[...].astype(jnp.bfloat16),
                 preferred_element_type=jnp.float32)
    h2 = jnp.maximum(h2 * s2_ref[...] + b2_ref[...], 0.0)
    h2 = h2.astype(jnp.bfloat16)

    # fc3 (no activation); lane-dense 128-wide bf16 store.
    h3 = jnp.dot(h2, w3_ref[...].astype(jnp.bfloat16),
                 preferred_element_type=jnp.float32)
    o_ref[...] = (h3 * s3_ref[...] + b3_ref[...]).astype(o_ref.dtype)


def quantize_per_out_channel(w):
    """Symmetric int8 quantization, one scale per output channel."""
    amax = jnp.max(jnp.abs(w), axis=0, keepdims=True)          # (1, out)
    scale = jnp.where(amax > 0, amax / 127.0, 1.0).astype(jnp.float32)
    q = jnp.clip(jnp.round(w / scale), -127, 127).astype(jnp.int8)
    return q, scale


def init_params(key, input_size=784, hidden_size=256, num_classes=10):
    """Deterministic fp32 init mimicking nn.Linear (uniform +/- 1/sqrt(fan_in))."""
    ks = jax.random.split(key, 6)

    def linear(kw, kb, fan_in, fan_out):
        bound = 1.0 / jnp.sqrt(fan_in)
        w = jax.random.uniform(kw, (fan_in, fan_out), jnp.float32, -bound, bound)
        b = jax.random.uniform(kb, (1, fan_out), jnp.float32, -bound, bound)
        return w, b

    w1, b1 = linear(ks[0], ks[1], input_size, hidden_size)
    w2, b2 = linear(ks[2], ks[3], hidden_size, hidden_size // 2)
    w3, b3 = linear(ks[4], ks[5], hidden_size // 2, num_classes)
    return (w1, b1, w2, b2, w3, b3)


def prepare_quantized_params(params):
    """Offline prep: lane-pad to multiples of 128 and int8-quantize the weights.

    Weights are pre-transposed to (in, out) so the kernel computes x @ W + b
    (== PyTorch's x @ W.T + b).  Padded rows/cols get q=0, scale=1, bias=0.
    """
    w1, b1, w2, b2, w3, b3 = params
    d_in = w1.shape[0]
    c = w3.shape[1]
    d_pad = _round_up(d_in, LANE)     # 784 -> 896: lane-aligned fc1 K sweep
    c_pad = _round_up(c, LANE)        # 10  -> 128: lane-dense output stores

    w1p = jnp.pad(w1, ((0, d_pad - d_in), (0, 0)))
    w3p = jnp.pad(w3, ((0, 0), (0, c_pad - c)))
    b3p = jnp.pad(b3, ((0, 0), (0, c_pad - c)))

    w1q, s1 = quantize_per_out_channel(w1p)
    w2q, s2 = quantize_per_out_channel(w2)
    w3q, s3 = quantize_per_out_channel(w3p)
    return (w1q, s1, b1, w2q, s2, b2, w3q, s3, b3p), c


def quantized_model_forward(x, qparams, num_classes):
    # TODO(synk): QuantStub/DeQuantStub imply calibrated int8 activation
    # quantization; activations are kept bf16 here (only weights are int8).
    w1q, s1, b1, w2q, s2, b2, w3q, s3, b3 = qparams
    B, _ = x.shape
    d_pad, h1 = w1q.shape
    h2 = w2q.shape[1]
    c_pad = w3q.shape[1]

    flops = 2 * B * (d_pad * h1 + h1 * h2 + h2 * c_pad)
    bytes_accessed = (x.size * 4 + w1q.size + w2q.size + w3q.size
                      + 4 * (s1.size + b1.size + s2.size + b2.size + s3.size + b3.size)
                      + B * c_pad * 2)

    # Single grid step: every operand is a plain full-array VMEM resident.
    vmem = pl.BlockSpec(memory_space=pltpu.MemorySpace.VMEM)
    out = pl.pallas_call(
        mlp_kernel,
        out_shape=jax.ShapeDtypeStruct((B, c_pad), jnp.bfloat16),
        in_specs=[vmem] * 10,
        out_specs=vmem,
        scratch_shapes=[pltpu.VMEM((B, d_pad), jnp.bfloat16)],
        cost_estimate=pl.CostEstimate(flops=flops, transcendentals=0,
                                      bytes_accessed=bytes_accessed),
        compiler_params=pltpu.CompilerParams(vmem_limit_bytes=32 * 1024 * 1024),
    )(x, w1q, s1, b1, w2q, s2, b2, w3q, s3, b3)
    return out[:, :num_classes]


if __name__ == "__main__":
    key = jax.random.PRNGKey(0)
    kx, kp = jax.random.split(key)

    batch_size = 32
    input_size = 784
    x = jax.random.normal(kx, (batch_size, input_size), dtype=jnp.float32)
    params = init_params(kp, input_size=input_size, hidden_size=256, num_classes=10)
    qparams, num_classes = prepare_quantized_params(params)

    out = quantized_model_forward(x, qparams, num_classes)
    jax.block_until_ready(out)
    assert out.shape == (batch_size, num_classes)
    out_f32 = out.astype(jnp.float32)

    # Reference 1: plain-JAX forward with identical scale-after-dot numerics.
    w1q, s1, b1, w2q, s2, b2, w3q, s3, b3 = qparams
    hp = jax.lax.Precision.HIGHEST
    d_pad = w1q.shape[0]
    xb = jnp.pad(x, ((0, 0), (0, d_pad - input_size)))
    xb = xb.astype(jnp.bfloat16).astype(jnp.float32)
    r = jnp.maximum(jnp.dot(xb, w1q.astype(jnp.float32), precision=hp) * s1 + b1, 0.0)
    r = r.astype(jnp.bfloat16).astype(jnp.float32)
    r = jnp.maximum(jnp.dot(r, w2q.astype(jnp.float32), precision=hp) * s2 + b2, 0.0)
    r = r.astype(jnp.bfloat16).astype(jnp.float32)
    r = jnp.dot(r, w3q.astype(jnp.float32), precision=hp) * s3 + b3
    ref_q = r.astype(jnp.bfloat16).astype(jnp.float32)[:, :num_classes]
    assert jnp.allclose(out_f32, ref_q, atol=2e-2, rtol=2e-2), float(
        jnp.max(jnp.abs(out_f32 - ref_q)))

    # Reference 2: unquantized fp32 forward (only quantization/bf16 noise expected).
    w1, b1f, w2, b2f, w3, b3f = params
    fref = jnp.maximum(jnp.dot(x, w1, precision=hp) + b1f, 0.0)
    fref = jnp.maximum(jnp.dot(fref, w2, precision=hp) + b2f, 0.0)
    fref = jnp.dot(fref, w3, precision=hp) + b3f
    assert jnp.allclose(out_f32, fref, atol=0.1, rtol=0.1), float(
        jnp.max(jnp.abs(out_f32 - fref)))

    print("KERNEL_OK")
</pallas_src>

<mosaic_0001>
module attributes {stable_mosaic.version = 11 : i64} {
  func.func @mlp_kernel(%arg0: memref<32x784xf32, #tpu.memory_space<vmem>>, %arg1: memref<896x256xi8, #tpu.memory_space<vmem>>, %arg2: memref<1x256xf32, #tpu.memory_space<vmem>>, %arg3: memref<1x256xf32, #tpu.memory_space<vmem>>, %arg4: memref<256x128xi8, #tpu.memory_space<vmem>>, %arg5: memref<1x128xf32, #tpu.memory_space<vmem>>, %arg6: memref<1x128xf32, #tpu.memory_space<vmem>>, %arg7: memref<128x128xi8, #tpu.memory_space<vmem>>, %arg8: memref<1x128xf32, #tpu.memory_space<vmem>>, %arg9: memref<1x128xf32, #tpu.memory_space<vmem>>, %arg10: memref<32x128xbf16, #tpu.memory_space<vmem>>, %arg11: memref<32x896xbf16, #tpu.memory_space<vmem>>) attributes {dimension_semantics = [], scalar_prefetch = 0 : i64, scratch_operands = 1 : i64, tpu.core_type = #tpu.core_type<tc>} {
    %cst = arith.constant 0.000000e+00 : bf16
    %0 = vector.broadcast %cst : bf16 to vector<32x896xbf16>
    %c0 = arith.constant 0 : index
    %c0_0 = arith.constant 0 : index
    %1 = vector.load %arg11[%c0, %c0_0] : memref<32x896xbf16, #tpu.memory_space<vmem>>, vector<32x896xbf16>
    tpu.vector_store %arg11[%c0, %c0_0], %0 {strides = array<i32>} : memref<32x896xbf16, #tpu.memory_space<vmem>>, vector<32x896xbf16>,
    %c0_1 = arith.constant 0 : index
    %c0_2 = arith.constant 0 : index
    %2 = vector.load %arg0[%c0_1, %c0_2] : memref<32x784xf32, #tpu.memory_space<vmem>>, vector<32x784xf32>
    %3 = arith.truncf %2 : vector<32x784xf32> to vector<32x784xbf16>
    %c0_3 = arith.constant 0 : index
    %c0_4 = arith.constant 0 : index
    %4 = vector.load %arg11[%c0_3, %c0_4] : memref<32x896xbf16, #tpu.memory_space<vmem>>, vector<32x784xbf16>
    tpu.vector_store %arg11[%c0_3, %c0_4], %3 {strides = array<i32>} : memref<32x896xbf16, #tpu.memory_space<vmem>>, vector<32x784xbf16>,
    %c0_5 = arith.constant 0 : index
    %c0_6 = arith.constant 0 : index
    %5 = vector.load %arg11[%c0_5, %c0_6] : memref<32x896xbf16, #tpu.memory_space<vmem>>, vector<32x896xbf16>
    %c0_7 = arith.constant 0 : index
    %c0_8 = arith.constant 0 : index
    %6 = vector.load %arg1[%c0_7, %c0_8] : memref<896x256xi8, #tpu.memory_space<vmem>>, vector<896x256xi8>
    %7 = arith.sitofp %6 : vector<896x256xi8> to vector<896x256xbf16>
    %cst_9 = arith.constant dense<0.000000e+00> : vector<32x256xf32>
    %8 = tpu.matmul %5, %7, %cst_9 {dimension_numbers = #tpu.dot_dimension_numbers<[1], [0], [0], [1], [0, 0, 1, 1], [], []>} : vector<32x896xbf16>, vector<896x256xbf16>, vector<32x256xf32> -> vector<32x256xf32>
    %c0_10 = arith.constant 0 : index
    %c0_11 = arith.constant 0 : index
    %9 = vector.load %arg2[%c0_10, %c0_11] : memref<1x256xf32, #tpu.memory_space<vmem>>, vector<1x256xf32>
    %10 = vector.broadcast %9 : vector<1x256xf32> to vector<32x256xf32>
    %11 = arith.mulf %8, %10 : vector<32x256xf32>
    %c0_12 = arith.constant 0 : index
    %c0_13 = arith.constant 0 : index
    %12 = vector.load %arg3[%c0_12, %c0_13] : memref<1x256xf32, #tpu.memory_space<vmem>>, vector<1x256xf32>
    %13 = vector.broadcast %12 : vector<1x256xf32> to vector<32x256xf32>
    %14 = arith.addf %11, %13 : vector<32x256xf32>
    %cst_14 = arith.constant 0.000000e+00 : f32
    %15 = vector.broadcast %cst_14 : f32 to vector<32x256xf32>
    %16 = arith.maximumf %14, %15 : vector<32x256xf32>
    %17 = arith.truncf %16 : vector<32x256xf32> to vector<32x256xbf16>
    %c0_15 = arith.constant 0 : index
    %c0_16 = arith.constant 0 : index
    %18 = vector.load %arg4[%c0_15, %c0_16] : memref<256x128xi8, #tpu.memory_space<vmem>>, vector<256x128xi8>
    %19 = arith.sitofp %18 : vector<256x128xi8> to vector<256x128xbf16>
    %cst_17 = arith.constant dense<0.000000e+00> : vector<32x128xf32>
    %20 = tpu.matmul %17, %19, %cst_17 {dimension_numbers = #tpu.dot_dimension_numbers<[1], [0], [0], [1], [0, 0, 1, 1], [], []>} : vector<32x256xbf16>, vector<256x128xbf16>, vector<32x128xf32> -> vector<32x128xf32>
    %c0_18 = arith.constant 0 : index
    %c0_19 = arith.constant 0 : index
    %21 = vector.load %arg5[%c0_18, %c0_19] : memref<1x128xf32, #tpu.memory_space<vmem>>, vector<1x128xf32>
    %22 = vector.broadcast %21 : vector<1x128xf32> to vector<32x128xf32>
    %23 = arith.mulf %20, %22 : vector<32x128xf32>
    %c0_20 = arith.constant 0 : index
    %c0_21 = arith.constant 0 : index
    %24 = vector.load %arg6[%c0_20, %c0_21] : memref<1x128xf32, #tpu.memory_space<vmem>>, vector<1x128xf32>
    %25 = vector.broadcast %24 : vector<1x128xf32> to vector<32x128xf32>
    %26 = arith.addf %23, %25 : vector<32x128xf32>
    %cst_22 = arith.constant 0.000000e+00 : f32
    %27 = vector.broadcast %cst_22 : f32 to vector<32x128xf32>
    %28 = arith.maximumf %26, %27 : vector<32x128xf32>
    %29 = arith.truncf %28 : vector<32x128xf32> to vector<32x128xbf16>
    %c0_23 = arith.constant 0 : index
    %c0_24 = arith.constant 0 : index
    %30 = vector.load %arg7[%c0_23, %c0_24] : memref<128x128xi8, #tpu.memory_space<vmem>>, vector<128x128xi8>
    %31 = arith.sitofp %30 : vector<128x128xi8> to vector<128x128xbf16>
    %cst_25 = arith.constant dense<0.000000e+00> : vector<32x128xf32>
    %32 = tpu.matmul %29, %31, %cst_25 {dimension_numbers = #tpu.dot_dimension_numbers<[1], [0], [0], [1], [0, 0, 1, 1], [], []>} : vector<32x128xbf16>, vector<128x128xbf16>, vector<32x128xf32> -> vector<32x128xf32>
    %c0_26 = arith.constant 0 : index
    %c0_27 = arith.constant 0 : index
    %33 = vector.load %arg8[%c0_26, %c0_27] : memref<1x128xf32, #tpu.memory_space<vmem>>, vector<1x128xf32>
    %34 = vector.broadcast %33 : vector<1x128xf32> to vector<32x128xf32>
    %35 = arith.mulf %32, %34 : vector<32x128xf32>
    %c0_28 = arith.constant 0 : index
    %c0_29 = arith.constant 0 : index
    %36 = vector.load %arg9[%c0_28, %c0_29] : memref<1x128xf32, #tpu.memory_space<vmem>>, vector<1x128xf32>
    %37 = vector.broadcast %36 : vector<1x128xf32> to vector<32x128xf32>
    %38 = arith.addf %35, %37 : vector<32x128xf32>
    %39 = arith.truncf %38 : vector<32x128xf32> to vector<32x128xbf16>
    %c0_30 = arith.constant 0 : index
    %c0_31 = arith.constant 0 : index
    %40 = vector.load %arg10[%c0_30, %c0_31] : memref<32x128xbf16, #tpu.memory_space<vmem>>, vector<32x128xbf16>
    tpu.vector_store %arg10[%c0_30, %c0_31], %39 {strides = array<i32>} : memref<32x128xbf16, #tpu.memory_space<vmem>>, vector<32x128xbf16>,
    return
  }
}

</mosaic_0001>

<bundles_post_ra>
// kernel: tpu_custom_call.1
= control target key start
LH: loop header
LB: loop body
LE: loop exit
PB: predicated region body
PF: predicated region fallthrough
CT: control target
= control target key end

     0   :  { %15 = vsyncpa [#allocation4], 0  ;;  %s1324_s0 = inlined_call_operand.hbm [shape: f32[32,784], index: 0, kind: input, shape index: {}]   ;;  %s1325_s1 = inlined_call_operand.hbm [shape: s8[896,256], index: 1, kind: input, shape index: {}]   ;;  %s1326_s2 = inlined_call_operand.vmem [shape: f32[1,256], index: 2, kind: input, shape index: {}]   ;;  %s1327_s3 = inlined_call_operand.vmem [shape: f32[1,256], index: 3, kind: input, shape index: {}]   ;;  %s1328_s4 = inlined_call_operand.hbm [shape: s8[256,128], index: 4, kind: input, shape index: {}]   ;;  %s1329_s5 = inlined_call_operand.vmem [shape: f32[1,128], index: 5, kind: input, shape index: {}]   ;;  %s1330_s6 = inlined_call_operand.vmem [shape: f32[1,128], index: 6, kind: input, shape index: {}]   ;;  %s1331_s7 = inlined_call_operand.hbm [shape: s8[128,128], index: 7, kind: input, shape index: {}]   ;;  %s1332_s8 = inlined_call_operand.vmem [shape: f32[1,128], index: 8, kind: input, shape index: {}]   ;;  %s1333_s9 = inlined_call_operand.vmem [shape: f32[1,128], index: 9, kind: input, shape index: {}]   ;;  %s1334_s10 = inlined_call_operand.hbm [shape: bf16[32,128], index: 10, kind: output, shape index: {}]  }
   0x1   :  { %16 = vsyncpa [#allocation7], 0 }
   0x2   :  { %17 = vsyncpa [#allocation10], 0 }
   0x3   :  { %18 = vsyncpa [#allocation5], 0  ;;  %s1069_s13 = smov [#allocation6]   ;;  %s951_s17 = scalar_lea.hbm %s1325_s1, 7168 }
   0x4   :  { %s36_s14 = sshll.u32 %s1069_s13, 4  ;;  %p952_p0 = scmp.ne.s32.totalorder %s1325_s1, %s951_s17  ;;  %s37_s14 = int_to_ptr.vmem [resolvable:$true] %s36_s14 }
   0x5   :  { %p955_p1 = scmp.lt.u32.totalorder %s951_s17, %s1325_s1 }
   0x7   :  { %p957_p2 = pnand %p955_p1, %p952_p0 }
   0x9   :  { %960 = shalt.err (!%p957_p2)
}
   0xa   :  { %s961_s22 = scalar_lea.vmem %s37_s14, 7168  ;;  %p966_p4 = scmp.lt.s32.totalorder %s37_s14, %s37_s14 }
   0xb   :  { %p962_p3 = scmp.ne.s32.totalorder %s37_s14, %s961_s22  ;;  %p967_p5 = scmp.lt.s32.totalorder %s961_s22, %s961_s22 }
   0xd   :  { %p968_p6 = por %p967_p5, %p966_p4 }
   0xf   :  { %p969_p7 = pnand %p968_p6, %p962_p3 }
  0x11   :  { %972 = shalt.err (!%p969_p7)
}
  0x12   :  { %s1070_s23 = smov 256   ;;  %s1071_s24 = smov 16  }
  0x13   :  { %42 = dma.hbm_to_vmem [thread:$0]  %s1325_s1, 7168, %s37_s14, [#allocation7], %s1070_s23, %s1070_s23, %s1071_s24  }
  0x14   :  { %s1072_s27 = smov [#allocation3]   ;;  %s973_s11 = scalar_lea.hbm %s1324_s0, 3584 }
  0x15   :  { %s24_s28 = sshll.u32 %s1072_s27, 4  ;;  %p974_p8 = scmp.ne.s32.totalorder %s1324_s0, %s973_s11  ;;  %s25_s28 = int_to_ptr.vmem [resolvable:$true] %s24_s28 }
  0x16   :  { %p977_p9 = scmp.lt.u32.totalorder %s973_s11, %s1324_s0 }
  0x18   :  { %p979_p10 = pnand %p977_p9, %p974_p8 }
  0x1a   :  { %982 = shalt.err (!%p979_p10)
}
  0x1b   :  { %s983_s17 = scalar_lea.vmem %s25_s28, 3584  ;;  %p988_p12 = scmp.lt.s32.totalorder %s25_s28, %s25_s28 }
  0x1c   :  { %p984_p11 = scmp.ne.s32.totalorder %s25_s28, %s983_s17  ;;  %p989_p13 = scmp.lt.s32.totalorder %s983_s17, %s983_s17 }
  0x1e   :  { %p990_p0 = por %p989_p13, %p988_p12 }
  0x20   :  { %p991_p1 = pnand %p990_p0, %p984_p11 }
  0x22   :  { %994 = shalt.err (!%p991_p1)
}
  0x23   :  { %s1073_s1 = smov 896   ;;  %s1074_s14 = smov 56  }
  0x24   :  { %30 = dma.hbm_to_vmem [thread:$0]  %s1324_s0, 3584, %s25_s28, [#allocation4], %s1073_s1, %s1073_s1, %s1074_s14  }
  0x25   :  { %s1075_s20 = smov [#allocation8]   ;;  %s995_s24 = scalar_lea.hbm %s1328_s4, 1024 }
  0x26   :  { %s52_s21 = sshll.u32 %s1075_s20, 4  ;;  %p996_p2 = scmp.ne.s32.totalorder %s1328_s4, %s995_s24  ;;  %s53_s21 = int_to_ptr.vmem [resolvable:$true] %s52_s21 }
  0x27   :  { %p999_p3 = scmp.lt.u32.totalorder %s995_s24, %s1328_s4 }
  0x29   :  { %p1001_p4 = pnand %p999_p3, %p996_p2 }
  0x2b   :  { %1004 = shalt.err (!%p1001_p4)
}
  0x2c   :  { %s1005_s30 = scalar_lea.vmem %s53_s21, 1024  ;;  %p1010_p6 = scmp.lt.s32.totalorder %s53_s21, %s53_s21 }
  0x2d   :  { %p1006_p5 = scmp.ne.s32.totalorder %s53_s21, %s1005_s30  ;;  %p1011_p7 = scmp.lt.s32.totalorder %s1005_s30, %s1005_s30 }
  0x2f   :  { %p1012_p8 = por %p1011_p7, %p1010_p6 }
  0x31   :  { %p1013_p9 = pnand %p1012_p8, %p1006_p5 }
  0x33   :  { %1016 = shalt.err (!%p1013_p9)
}
  0x34   :  { %s1076_s0 = smov 128   ;;  %s1077_s28 = smov 8  }
  0x35   :  { %58 = dma.hbm_to_vmem [thread:$0]  %s1328_s4, 1024, %s53_s21, [#allocation7], %s1076_s0, %s1076_s0, %s1077_s28  }
  0x36   :  { %s1078_s13 = smov [#allocation9]   ;;  %s1017_s1 = scalar_lea.hbm %s1331_s7, 512 }
  0x37   :  { %s68_s15 = sshll.u32 %s1078_s13, 4  ;;  %p1018_p10 = scmp.ne.s32.totalorder %s1331_s7, %s1017_s1  ;;  %s69_s15 = int_to_ptr.vmem [resolvable:$true] %s68_s15 }
  0x38   :  { %p1021_p11 = scmp.lt.u32.totalorder %s1017_s1, %s1331_s7 }
  0x3a   :  { %p1023_p12 = pnand %p1021_p11, %p1018_p10 }
  0x3c   :  { %1026 = shalt.err (!%p1023_p12)
}
  0x3d   :  { %s1027_s22 = scalar_lea.vmem %s69_s15, 512  ;;  %p1032_p0 = scmp.lt.s32.totalorder %s69_s15, %s69_s15 }
  0x3e   :  { %p1028_p13 = scmp.ne.s32.totalorder %s69_s15, %s1027_s22  ;;  %p1033_p1 = scmp.lt.s32.totalorder %s1027_s22, %s1027_s22 }
  0x40   :  { %p1034_p2 = por %p1033_p1, %p1032_p0 }
  0x42   :  { %p1035_p3 = pnand %p1034_p2, %p1028_p13 }
  0x44   :  { %1038 = shalt.err (!%p1035_p3)
}
  0x45   :  { %74 = dma.hbm_to_vmem [thread:$0]  %s1331_s7, 512, %s69_s15, [#allocation10], %s1076_s0, %s1076_s0, %s1077_s28  }
  0x46   :  { %1061 = dma.done.wait [#allocation4], 3584  }
  0x47   :  { %1062 = vsyncadd [#allocation4], 4294963712 }
  0x48   :  { %1063 = dma.done.wait [#allocation7], 8192  }
  0x49   :  { %1064 = vsyncadd [#allocation7], 4294959104 }
  0x4a   :  { %1065 = dma.done.wait [#allocation10], 512  }
  0x4b   :  { %1066 = vsyncadd [#allocation10], 4294966784  ;;  %v1079_v0 = vmov 0   ;;  %v194_v1 = vld [vmem:[#allocation6 + $0x88] sm:$0xff]  ;;  %v193_v2 = vld [vmem:[#allocation6 + $0x80] sm:$0xff]  ;;  %vm154_vm0 = vcmask 130048  }
  0x4c   :  { %98 = vst [vmem:[#allocation2 + $0x30] sm:$0xff] %v1079_v0  ;;  %105 = vst [vmem:[#allocation2 + $0x68] sm:$0xff] %v1079_v0  ;;  %v266_v3 = vunpack.c.l.s8.bf16 %v194_v1  ;;  %v268_v4 = vunpack.c.h.s8.bf16 %v194_v1  ;;  %v265_v5 = vunpack.c.l.s8.bf16 %v193_v2  ;;  %v196_v6 = vld [vmem:[#allocation6 + $0x98] sm:$0xff]  ;;  %v178_v7 = vld [vmem:[#allocation6 + $0x8] sm:$0xff]  ;;  %v267_v9 = vunpack.c.h.s8.bf16 %v193_v2  ;;  %s1080_s0 = smov [#allocation11]  }
  0x4d   :  { %v177_v8 = vld [vmem:[#allocation6] sm:$0xff]  ;;  %v270_v10 = vunpack.c.l.s8.bf16 %v196_v6  ;;  %v195_v11 = vld [vmem:[#allocation6 + $0x90] sm:$0xff]  ;;  %v234_v12 = vunpack.c.l.s8.bf16 %v178_v7  ;;  %v236_v13 = vunpack.c.h.s8.bf16 %v178_v7  ;;  %v180_v15 = vld [vmem:[#allocation6 + $0x18] sm:$0xff]  ;;  %v272_v18 = vunpack.c.h.s8.bf16 %v196_v6  ;;  %s818_s28 = sshll.u32 %s1080_s0, 4  ;;  %s819_s28 = int_to_ptr.vmem [resolvable:$true] %s818_s28 }
  0x4e   :  { %398 = vmatprep.subr.bf16.mxu0 %v266_v3  ;;  %v233_v14 = vunpack.c.l.s8.bf16 %v177_v8  ;;  %v269_v16 = vunpack.c.l.s8.bf16 %v195_v11  ;;  %v235_v17 = vunpack.c.h.s8.bf16 %v177_v8  ;;  %v238_v19 = vunpack.c.l.s8.bf16 %v180_v15  ;;  %v179_v20 = vld [vmem:[#allocation6 + $0x10] sm:$0xff]  ;;  %v198_v21 = vld [vmem:[#allocation6 + $0xa8] sm:$0xff]  ;;  %v109_v22 = vld [vmem:[#allocation3 + $0x18] sm:$0xff]  ;;  %p1044_p5 = scmp.lt.s32.totalorder %s819_s28, %s819_s28 }
  0x4f   :  { %399 = vmatpush1.bf16.msra.mxu0 %v265_v5  ;;  %345 = vmatprep.subr.bf16.mxu1 %v234_v12  ;;  %v116_v23 = vld [vmem:[#allocation3 + $0x50] sm:$0xff]  ;;  %v1190_v25 = vld [vmem:[#allocation3 + $0x48] sm:$0xff]  ;;  %v271_v26 = vunpack.c.h.s8.bf16 %v195_v11  ;;  %v237_v27 = vunpack.c.l.s8.bf16 %v179_v20  ;;  %v274_v28 = vunpack.c.l.s8.bf16 %v198_v21  ;;  %v197_v29 = vld [vmem:[#allocation6 + $0xa0] sm:$0xff]  ;;  %v240_v30 = vunpack.c.h.s8.bf16 %v180_v15 }
  0x50   :  { %400 = vmatprep.subr.bf16.mxu0 %v268_v4  ;;  %346 = vmatpush1.bf16.msra.mxu1 %v233_v14  ;;  %v1188_v24 = vld [vmem:[#allocation3 + $0x10] sm:$0xff]  ;;  %v137_v31 = vpack.c.bf16 %v116_v23, %v109_v22  ;;  %v182_v32 = vld [vmem:[#allocation6 + $0x28] sm:$0xff]  ;;  %v273_v34 = vunpack.c.l.s8.bf16 %v197_v29  ;;  %v239_v35 = vunpack.c.h.s8.bf16 %v179_v20  ;;  %v276_v36 = vunpack.c.h.s8.bf16 %v198_v21  ;;  %v181_v38 = vld [vmem:[#allocation6 + $0x20] sm:$0xff] }
  0x51   :  { %347 = vmatprep.subr.bf16.mxu1 %v236_v13  ;;  %v136_v33 = vpack.c.bf16 %v1190_v25, %v1188_v24  ;;  %v242_v37 = vunpack.c.l.s8.bf16 %v182_v32  ;;  %v200_v39 = vld [vmem:[#allocation6 + $0xb8] sm:$0xff]  ;;  %v107_v40 = vld [vmem:[#allocation3 + $0x8] sm:$0xff]  ;;  %v114_v41 = vld [vmem:[#allocation3 + $0x40] sm:$0xff]  ;;  %v275_v44 = vunpack.c.h.s8.bf16 %v197_v29  ;;  %v241_v45 = vunpack.c.l.s8.bf16 %v181_v38 }
  0x52   :  { %430 = vmatprep.mubr.bf16.mxu0 %v137_v31  ;;  %v1194_v42 = vld [vmem:[#allocation3] sm:$0xff]  ;;  %v1196_v43 = vld [vmem:[#allocation3 + $0x38] sm:$0xff]  ;;  %v278_v46 = vunpack.c.l.s8.bf16 %v200_v39  ;;  %v199_v47 = vld [vmem:[#allocation6 + $0xb0] sm:$0xff]  ;;  %v244_v48 = vunpack.c.h.s8.bf16 %v182_v32  ;;  %v135_v49 = vpack.c.bf16 %v114_v41, %v107_v40  ;;  %v243_v57 = vunpack.c.h.s8.bf16 %v181_v38 }
  0x53   :  { %401 = vmatpush1.bf16.msra.mxu0 %v267_v9  ;;  %v184_v50 = vld [vmem:[#allocation6 + $0x38] sm:$0xff]  ;;  %v134_v51 = vpack.c.bf16 %v1196_v43, %v1194_v42  ;;  %v1200_v52 = vld [vmem:[#allocation6 + $0x30] sm:$0xff]  ;;  %v277_v55 = vunpack.c.l.s8.bf16 %v199_v47  ;;  %v202_v56 = vld [vmem:[#allocation6 + $0xc8] sm:$0xff]  ;;  %v280_v61 = vunpack.c.h.s8.bf16 %v200_v39  ;;  %v279_v6 = vunpack.c.h.s8.bf16 %v199_v47 }
  0x54   :  { %402 = vmatprep.subr.bf16.mxu0 %v270_v10  ;;  %348 = vmatpush1.bf16.msra.mxu1 %v235_v17  ;;  %v1202_v53 = vld [vmem:[#allocation3 + $0x78] sm:$0xff]  ;;  %v1204_v54 = vld [vmem:[#allocation3 + $0xb0] sm:$0xff]  ;;  %v1208_v59 = vld [vmem:[#allocation3 + $0xa8] sm:$0xff]  ;;  %v246_v62 = vunpack.c.l.s8.bf16 %v184_v50  ;;  %v245_v11 = vunpack.c.l.s8.bf16 %v1200_v52  ;;  %v247_v32 = vunpack.c.h.s8.bf16 %v1200_v52 }
  0x55   :  { %349 = vmatprep.subr.bf16.mxu1 %v238_v19  ;;  %377 = vmatprep.mubr.bf16.mxu1 %v135_v49  ;;  %v1206_v58 = vld [vmem:[#allocation3 + $0x70] sm:$0xff]  ;;  %v1210_v60 = vld [vmem:[#allocation3 + $0x88] sm:$0xff]  ;;  %v1212_v63 = vld [vmem:[#allocation3 + $0xc0] sm:$0xff]  ;;  %v142_v12 = vpack.c.bf16 %v1204_v54, %v1202_v53  ;;  %v248_v19 = vunpack.c.h.s8.bf16 %v184_v50 }
  0x56   :  { %v1214_v1 = vld [vmem:[#allocation3 + $0x80] sm:$0xff]  ;;  %v1216_v2 = vld [vmem:[#allocation3 + $0xb8] sm:$0xff]  ;;  %v1218_v3 = vld [vmem:[#allocation3 + $0x28] sm:$0xff]  ;;  %v141_v13 = vpack.c.bf16 %v1208_v59, %v1206_v58  ;;  %v144_v14 = vpack.c.bf16 %v1212_v63, %v1210_v60 }
  0x57   :  { %403 = vmatpush1.bf16.msra.mxu0 %v269_v16  ;;  %v1220_v4 = vld [vmem:[#allocation3 + $0x60] sm:$0xff]  ;;  %v112_v5 = vld [vmem:[#allocation3 + $0x30] sm:$0xff]  ;;  %v119_v8 = vld [vmem:[#allocation3 + $0x68] sm:$0xff]  ;;  %v143_v20 = vpack.c.bf16 %v1216_v2, %v1214_v1 }
  0x58   :  { %404 = vmatprep.subr.bf16.mxu0 %v272_v18  ;;  %350 = vmatpush1.bf16.msra.mxu1 %v237_v27  ;;  %v201_v7 = vld [vmem:[#allocation6 + $0xc0] sm:$0xff]  ;;  %v1224_v10 = vld [vmem:[#allocation3 + $0x58] sm:$0xff]  ;;  %v1235_v16 = vld [vmem:[#allocation3 + $0xd0] sm:$0xff]  ;;  %v282_v18 = vunpack.c.l.s8.bf16 %v202_v56  ;;  %v139_v27 = vpack.c.bf16 %v1220_v4, %v1218_v3 }
  0x59   :  { %351 = vmatprep.subr.bf16.mxu1 %v240_v30  ;;  %v1222_v9 = vld [vmem:[#allocation3 + $0x20] sm:$0xff]  ;;  %v1233_v15 = vld [vmem:[#allocation3 + $0x98] sm:$0xff]  ;;  %v1239_v22 = vld [vmem:[#allocation3 + $0x90] sm:$0xff]  ;;  %v281_v31 = vunpack.c.l.s8.bf16 %v201_v7  ;;  %v283_v40 = vunpack.c.h.s8.bf16 %v201_v7 }
  0x5a   :  { %v126_v17 = vld [vmem:[#allocation3 + $0xa0] sm:$0xff]  ;;  %v133_v21 = vld [vmem:[#allocation3 + $0xd8] sm:$0xff]  ;;  %v1241_v23 = vld [vmem:[#allocation3 + $0xc8] sm:$0xff]  ;;  %v138_v29 = vpack.c.bf16 %v1224_v10, %v1222_v9  ;;  %v146_v30 = vpack.c.bf16 %v1235_v16, %v1233_v15 }
  0x5b   :  { %405 = vmatpush1.bf16.msra.mxu0 %v271_v26  ;;  %v186_v26 = vld [vmem:[#allocation6 + $0x48] sm:$0xff]  ;;  %v185_v38 = vld [vmem:[#allocation6 + $0x40] sm:$0xff]  ;;  %v204_v39 = vld [vmem:[#allocation6 + $0xd8] sm:$0xff] }
  0x5c   :  { %406 = vmatprep.subr.bf16.mxu0 %v274_v28  ;;  %352 = vmatpush1.bf16.msra.mxu1 %v239_v35  ;;  %v140_v28 = vpack.c.bf16 %v119_v8, %v112_v5  ;;  %v145_v35 = vpack.c.bf16 %v1241_v23, %v1239_v22  ;;  %v249_v41 = vunpack.c.l.s8.bf16 %v185_v38  ;;  %v188_v47 = vld [vmem:[#allocation6 + $0x58] sm:$0xff]  ;;  %v251_v49 = vunpack.c.h.s8.bf16 %v185_v38  ;;  %v205_v5 = vld [vmem:[#allocation6 + $0xe0] sm:$0xff]  ;;  %v190_v7 = vld [vmem:[#allocation6 + $0x68] sm:$0xff] }
  0x5d   :  { %353 = vmatprep.subr.bf16.mxu1 %v242_v37  ;;  %v250_v37 = vunpack.c.l.s8.bf16 %v186_v26  ;;  %v288_v50 = vunpack.c.h.s8.bf16 %v204_v39  ;;  %v254_v52 = vunpack.c.l.s8.bf16 %v188_v47  ;;  %v289_v8 = vunpack.c.l.s8.bf16 %v205_v5  ;;  %v213_v60 = vld [vmem:[#allocation6 + $0x120] sm:$0xff]  ;;  %v215_v58 = vld [vmem:[#allocation6 + $0x130] sm:$0xff]  ;;  %v610_v10 = vld [vmem:[#allocation8 + $0x8] sm:$0xff] }
  0x5e   :  { %155 = vst.msk [vmem:[#allocation2 + $0x30] sm:$0xff] %vm154_vm0, %v140_v28  ;;  %v305_v53 = vunpack.c.l.s8.bf16 %v213_v60  ;;  %v620_v16 = vunpack.c.h.s8.bf16 %v610_v10  ;;  %v615_v22 = vld [vmem:[#allocation8 + $0x30] sm:$0xff] }
  0x5f   :  { %407 = vmatpush1.bf16.msra.mxu0 %v273_v34  ;;  %v147_v34 = vpack.c.bf16 %v133_v21, %v126_v17  ;;  %v208_v21 = vld [vmem:[#allocation6 + $0xf8] sm:$0xff]  ;;  %v629_v23 = vunpack.c.l.s8.bf16 %v615_v22 }
  0x60   :  { %408 = vmatprep.subr.bf16.mxu0 %v276_v36  ;;  %354 = vmatpush1.bf16.msra.mxu1 %v241_v45  ;;  %v284_v36 = vunpack.c.h.s8.bf16 %v202_v56  ;;  %v203_v45 = vld [vmem:[#allocation6 + $0xd0] sm:$0xff]  ;;  %v206_v56 = vld [vmem:[#allocation6 + $0xe8] sm:$0xff] }
  0x61   :  { %355 = vmatprep.subr.bf16.mxu1 %v244_v48  ;;  %162 = vst.msk [vmem:[#allocation2 + $0x68] sm:$0xff] %vm154_vm0, %v147_v34  ;;  %v285_v48 = vunpack.c.l.s8.bf16 %v203_v45  ;;  %v292_v17 = vunpack.c.h.s8.bf16 %v206_v56  ;;  %v260_v34 = vunpack.c.h.s8.bf16 %v190_v7 }
  0x63   :  { %409 = vmatpush1.bf16.msra.mxu0 %v275_v44  ;;  %v286_v44 = vunpack.c.l.s8.bf16 %v204_v39  ;;  %v296_v39 = vunpack.c.h.s8.bf16 %v208_v21 }
  0x64   :  { %410 = vmatprep.subr.bf16.mxu0 %v278_v46  ;;  %356 = vmatpush1.bf16.msra.mxu1 %v243_v57  ;;  %v252_v46 = vunpack.c.h.s8.bf16 %v186_v26  ;;  %v287_v57 = vunpack.c.h.s8.bf16 %v203_v45  ;;  %v291_v26 = vunpack.c.h.s8.bf16 %v205_v5 }
  0x65   :  { %357 = vmatprep.subr.bf16.mxu1 %v246_v62  ;;  %v290_v62 = vunpack.c.l.s8.bf16 %v206_v56 }
  0x67   :  { %411 = vmatpush1.bf16.msra.mxu0 %v277_v55  ;;  %v187_v55 = vld [vmem:[#allocation6 + $0x50] sm:$0xff] }
  0x68   :  { %412 = vmatprep.subr.bf16.mxu0 %v280_v61  ;;  %358 = vmatpush1.bf16.msra.mxu1 %v245_v11  ;;  %v253_v61 = vunpack.c.l.s8.bf16 %v187_v55  ;;  %v255_v11 = vunpack.c.h.s8.bf16 %v187_v55 }
  0x69   :  { %359 = vmatprep.subr.bf16.mxu1 %v248_v19  ;;  %v189_v19 = vld [vmem:[#allocation6 + $0x60] sm:$0xff] }
  0x6a   :  { %v257_v28 = vunpack.c.l.s8.bf16 %v189_v19  ;;  %v259_v38 = vunpack.c.h.s8.bf16 %v189_v19  ;;  %v227_v19 = vld [vmem:[#allocation6 + $0x190] sm:$0xff] }
  0x6b   :  { %413 = vmatpush1.bf16.msra.mxu0 %v279_v6  ;;  %v256_v6 = vunpack.c.h.s8.bf16 %v188_v47  ;;  %v333_v43 = vunpack.c.l.s8.bf16 %v227_v19  ;;  %v335_v54 = vunpack.c.h.s8.bf16 %v227_v19  ;;  %v613_v19 = vld [vmem:[#allocation8 + $0x20] sm:$0xff] }
  0x6c   :  { %414 = vmatprep.subr.bf16.mxu0 %v282_v18  ;;  %360 = vmatpush1.bf16.msra.mxu1 %v247_v32  ;;  %v258_v18 = vunpack.c.l.s8.bf16 %v190_v7  ;;  %v207_v32 = vld [vmem:[#allocation6 + $0xf0] sm:$0xff] }
  0x6d   :  { %361 = vmatprep.subr.bf16.mxu1 %v250_v37  ;;  %v293_v37 = vunpack.c.l.s8.bf16 %v207_v32  ;;  %v295_v45 = vunpack.c.h.s8.bf16 %v207_v32 }
  0x6f   :  { %415 = vmatpush1.bf16.msra.mxu0 %v281_v31  ;;  %v294_v31 = vunpack.c.l.s8.bf16 %v208_v21  ;;  %v214_v21 = vld [vmem:[#allocation6 + $0x128] sm:$0xff] }
  0x70   :  { %416 = vmatprep.subr.bf16.mxu0 %v284_v36  ;;  %362 = vmatpush1.bf16.msra.mxu1 %v249_v41  ;;  %v192_v36 = vld [vmem:[#allocation6 + $0x78] sm:$0xff]  ;;  %v191_v41 = vld [vmem:[#allocation6 + $0x70] sm:$0xff]  ;;  %v308_v1 = vunpack.c.h.s8.bf16 %v214_v21 }
  0x71   :  { %363 = vmatprep.subr.bf16.mxu1 %v252_v46  ;;  %v261_v46 = vunpack.c.l.s8.bf16 %v191_v41  ;;  %v263_v55 = vunpack.c.h.s8.bf16 %v191_v41 }
  0x73   :  { %417 = vmatpush1.bf16.msra.mxu0 %v283_v40  ;;  %v262_v40 = vunpack.c.l.s8.bf16 %v192_v36 }
  0x74   :  { %418 = vmatprep.subr.bf16.mxu0 %v286_v44  ;;  %364 = vmatpush1.bf16.msra.mxu1 %v251_v49  ;;  %v210_v44 = vld [vmem:[#allocation6 + $0x108] sm:$0xff]  ;;  %v264_v49 = vunpack.c.h.s8.bf16 %v192_v36 }
  0x75   :  { %365 = vmatprep.subr.bf16.mxu1 %v254_v52  ;;  %v298_v47 = vunpack.c.l.s8.bf16 %v210_v44  ;;  %v300_v56 = vunpack.c.h.s8.bf16 %v210_v44  ;;  %v218_v36 = vld [vmem:[#allocation6 + $0x148] sm:$0xff] }
  0x77   :  { %419 = vmatpush1.bf16.msra.mxu0 %v285_v48  ;;  %v209_v48 = vld [vmem:[#allocation6 + $0x100] sm:$0xff] }
  0x78   :  { %420 = vmatprep.subr.bf16.mxu0 %v288_v50  ;;  %366 = vmatpush1.bf16.msra.mxu1 %v253_v61  ;;  %v226_v50 = vld [vmem:[#allocation6 + $0x188] sm:$0xff]  ;;  %v297_v52 = vunpack.c.l.s8.bf16 %v209_v48  ;;  %v225_v61 = vld [vmem:[#allocation6 + $0x180] sm:$0xff]  ;;  %v299_v5 = vunpack.c.h.s8.bf16 %v209_v48 }
  0x79   :  { %367 = vmatprep.subr.bf16.mxu1 %v256_v6  ;;  %v329_v6 = vunpack.c.l.s8.bf16 %v225_v61  ;;  %v331_v25 = vunpack.c.h.s8.bf16 %v225_v61 }
  0x7b   :  { %421 = vmatpush1.bf16.msra.mxu0 %v287_v57  ;;  %v330_v57 = vunpack.c.l.s8.bf16 %v226_v50 }
  0x7c   :  { %422 = vmatprep.subr.bf16.mxu0 %v290_v62  ;;  %368 = vmatpush1.bf16.msra.mxu1 %v255_v11  ;;  %v212_v62 = vld [vmem:[#allocation6 + $0x118] sm:$0xff]  ;;  %v332_v11 = vunpack.c.h.s8.bf16 %v226_v50 }
  0x7d   :  { %369 = vmatprep.subr.bf16.mxu1 %v258_v18  ;;  %v302_v7 = vunpack.c.l.s8.bf16 %v212_v62 }
  0x7f   :  { %423 = vmatpush1.bf16.msra.mxu0 %v289_v8  ;;  %v211_v8 = vld [vmem:[#allocation6 + $0x110] sm:$0xff] }
  0x80   :  { %424 = vmatprep.subr.bf16.mxu0 %v292_v17  ;;  %370 = vmatpush1.bf16.msra.mxu1 %v257_v28  ;;  %v228_v17 = vld [vmem:[#allocation6 + $0x198] sm:$0xff]  ;;  %v301_v24 = vunpack.c.l.s8.bf16 %v211_v8  ;;  %v303_v42 = vunpack.c.h.s8.bf16 %v211_v8 }
  0x81   :  { %371 = vmatprep.subr.bf16.mxu1 %v260_v34  ;;  %v334_v18 = vunpack.c.l.s8.bf16 %v228_v17  ;;  %v336_v63 = vunpack.c.h.s8.bf16 %v228_v17  ;;  %v231_v34 = vld [vmem:[#allocation6 + $0x1b0] sm:$0xff] }
  0x83   :  { %425 = vmatpush1.bf16.msra.mxu0 %v291_v26  ;;  %v307_v26 = vunpack.c.h.s8.bf16 %v213_v60 }
  0x84   :  { %426 = vmatprep.subr.bf16.mxu0 %v294_v31  ;;  %372 = vmatpush1.bf16.msra.mxu1 %v259_v38  ;;  %v341_v38 = vunpack.c.l.s8.bf16 %v231_v34 }
  0x85   :  { %373 = vmatprep.subr.bf16.mxu1 %v262_v40  ;;  %v217_v40 = vld [vmem:[#allocation6 + $0x140] sm:$0xff] }
  0x86   :  { %v313_v44 = vunpack.c.l.s8.bf16 %v217_v40  ;;  %v315_v48 = vunpack.c.h.s8.bf16 %v217_v40 }
  0x87   :  { %427 = vmatpush1.bf16.msra.mxu0 %v293_v37  ;;  %v311_v37 = vunpack.c.h.s8.bf16 %v215_v58 }
  0x88   :  { %428 = vmatprep.subr.bf16.mxu0 %v296_v39  ;;  %374 = vmatpush1.bf16.msra.mxu1 %v261_v46  ;;  %v314_v39 = vunpack.c.l.s8.bf16 %v218_v36  ;;  %v316_v46 = vunpack.c.h.s8.bf16 %v218_v36 }
  0x89   :  { %375 = vmatprep.subr.bf16.mxu1 %v264_v49  ;;  %v169_v49 = vld [vmem:[#allocation2 + $0x30] sm:$0xff] }
  0x8b   :  { %429 = vmatpush1.bf16.msra.mxu0 %v295_v45  ;;  %v343_v45 = vunpack.c.h.s8.bf16 %v231_v34 }
  0x8c   :  { %451 = vmatprep.subr.bf16.mxu0 %v298_v47  ;;  %376 = vmatpush1.bf16.msra.mxu1 %v263_v55  ;;  %v220_v47 = vld [vmem:[#allocation6 + $0x158] sm:$0xff] }
  0x8d   :  { %504 = vmatprep.subr.bf16.mxu1 %v330_v57  ;;  %v318_v50 = vunpack.c.l.s8.bf16 %v220_v47  ;;  %v222_v57 = vld [vmem:[#allocation6 + $0x168] sm:$0xff] }
  0x8e   :  { %431 = vmatmul.mubr.bf16.vlgmr.msra.gmra.mrb[0].mxu0 %v136_v33  ;;  %v304_v33 = vunpack.c.h.s8.bf16 %v212_v62  ;;  %v176_v62 = vld [vmem:[#allocation2 + $0x68] sm:$0xff]  ;;  %v324_v8 = vunpack.c.h.s8.bf16 %v222_v57 }
  0x8f   :  { %452 = vmatpush1.bf16.msra.mxu0 %v297_v52  ;;  %440 = vmatprep.mubr.bf16.mxu0 %v144_v14  ;;  %v230_v14 = vld [vmem:[#allocation6 + $0x1a8] sm:$0xff]  ;;  %v219_v52 = vld [vmem:[#allocation6 + $0x150] sm:$0xff] }
  0x90   :  { %453 = vmatprep.subr.bf16.mxu0 %v300_v56  ;;  %378 = vmatmul.mubr.bf16.vlgmr.msra.gmra.mrb[0].mxu1 %v134_v51  ;;  %v306_v51 = vunpack.c.l.s8.bf16 %v214_v21  ;;  %v338_v2 = vunpack.c.l.s8.bf16 %v230_v14  ;;  %v340_v59 = vunpack.c.h.s8.bf16 %v230_v14  ;;  %v317_v55 = vunpack.c.l.s8.bf16 %v219_v52  ;;  %v609_v21 = vld [vmem:[#allocation8] sm:$0xff] }
  0x91   :  { %505 = vmatpush1.bf16.msra.mxu1 %v329_v6  ;;  %387 = vmatprep.mubr.bf16.mxu1 %v142_v12  ;;  %v229_v12 = vld [vmem:[#allocation6 + $0x1a0] sm:$0xff]  ;;  %v320_v56 = vunpack.c.h.s8.bf16 %v220_v47  ;;  %v319_v61 = vunpack.c.h.s8.bf16 %v219_v52  ;;  %v618_v60 = vunpack.c.h.s8.bf16 %v609_v21  ;;  %v630_v14 = vunpack.c.h.s8.bf16 %v615_v22 }
  0x92   :  { %506 = vmatprep.subr.bf16.mxu1 %v332_v11  ;;  %v337_v3 = vunpack.c.l.s8.bf16 %v229_v12  ;;  %v339_v28 = vunpack.c.h.s8.bf16 %v229_v12  ;;  %v221_v6 = vld [vmem:[#allocation6 + $0x160] sm:$0xff]  ;;  %v224_v11 = vld [vmem:[#allocation6 + $0x178] sm:$0xff] }
  0x93   :  { %454 = vmatpush1.bf16.msra.mxu0 %v299_v5  ;;  %v322_v5 = vunpack.c.l.s8.bf16 %v222_v57  ;;  %v323_v17 = vunpack.c.h.s8.bf16 %v221_v6 }
  0x94   :  { %455 = vmatprep.subr.bf16.mxu0 %v302_v7  ;;  %v321_v7 = vunpack.c.l.s8.bf16 %v221_v6 }
  0x95   :  { %507 = vmatpush1.bf16.msra.mxu1 %v331_v25 }
  0x96   :  { %441 = vmatmul.mubr.bf16.gmra.mrb[4].mxu0 %v143_v20  ;;  %508 = vmatprep.subr.bf16.mxu1 %v334_v18  ;;  %v216_v20 = vld [vmem:[#allocation6 + $0x138] sm:$0xff] }
  0x97   :  { %456 = vmatpush1.bf16.msra.mxu0 %v301_v24  ;;  %483 = vmatprep.mubr.bf16.mxu0 %v139_v27  ;;  %v310_v4 = vunpack.c.l.s8.bf16 %v216_v20  ;;  %v309_v27 = vunpack.c.l.s8.bf16 %v215_v58  ;;  %v312_v31 = vunpack.c.h.s8.bf16 %v216_v20  ;;  %v326_v24 = vunpack.c.l.s8.bf16 %v224_v11 }
  0x98   :  { %457 = vmatprep.subr.bf16.mxu0 %v304_v33  ;;  %388 = vmatmul.mubr.bf16.gmra.mrb[4].mxu1 %v141_v13  ;;  %v232_v13 = vld [vmem:[#allocation6 + $0x1b8] sm:$0xff]  ;;  %v328_v33 = vunpack.c.h.s8.bf16 %v224_v11 }
  0x99   :  { %509 = vmatpush1.bf16.msra.mxu1 %v333_v43  ;;  %536 = vmatprep.mubr.bf16.mxu1 %v1079_v0  ;;  %v342_v32 = vunpack.c.l.s8.bf16 %v232_v13  ;;  %v344_v41 = vunpack.c.h.s8.bf16 %v232_v13  ;;  %v617_v43 = vunpack.c.l.s8.bf16 %v609_v21 }
  0x9a   :  { %510 = vmatprep.subr.bf16.mxu1 %v336_v63  ;;  %v614_v63 = vld [vmem:[#allocation8 + $0x28] sm:$0xff] }
  0x9b   :  { %458 = vmatpush1.bf16.msra.mxu0 %v303_v42  ;;  %v625_v42 = vunpack.c.l.s8.bf16 %v613_v19  ;;  %v627_v9 = vunpack.c.l.s8.bf16 %v614_v63  ;;  %v628_v15 = vunpack.c.h.s8.bf16 %v614_v63 }
  0x9c   :  { %459 = vmatprep.subr.bf16.mxu0 %v306_v51  ;;  %v626_v51 = vunpack.c.h.s8.bf16 %v613_v19 }
  0x9d   :  { %511 = vmatpush1.bf16.msra.mxu1 %v335_v54  ;;  %v616_v54 = vld [vmem:[#allocation8 + $0x38] sm:$0xff] }
  0x9e   :  { %512 = vmatprep.subr.bf16.mxu1 %v338_v2  ;;  %v612_v2 = vld [vmem:[#allocation8 + $0x18] sm:$0xff]  ;;  %v632_v20 = vunpack.c.h.s8.bf16 %v616_v54 }
  0x9f   :  { %460 = vmatpush1.bf16.msra.mxu0 %v305_v53  ;;  %v623_v12 = vunpack.c.l.s8.bf16 %v612_v2 }
  0xa0   :  { %461 = vmatprep.subr.bf16.mxu0 %v308_v1  ;;  %v631_v1 = vunpack.c.l.s8.bf16 %v616_v54 }
  0xa1   :  { %513 = vmatpush1.bf16.msra.mxu1 %v337_v3  ;;  %v1286_v3 = vld [vmem:[#allocation9] sm:$0xff] }
  0xa2   :  { %514 = vmatprep.subr.bf16.mxu1 %v340_v59 }
  0xa3   :  { %462 = vmatpush1.bf16.msra.mxu0 %v307_v26  ;;  %v624_v26 = vunpack.c.h.s8.bf16 %v612_v2 }
  0xa4   :  { %463 = vmatprep.subr.bf16.mxu0 %v310_v4  ;;  %v714_v4 = vunpack.c.l.s8.bf16 %v1286_v3 }
  0xa5   :  { %515 = vmatpush1.bf16.msra.mxu1 %v339_v28 }
  0xa6   :  { %516 = vmatprep.subr.bf16.mxu1 %v342_v32 }
  0xa7   :  { %464 = vmatpush1.bf16.msra.mxu0 %v309_v27 }
  0xa8   :  { %465 = vmatprep.subr.bf16.mxu0 %v312_v31 }
  0xa9   :  { %517 = vmatpush1.bf16.msra.mxu1 %v341_v38 }
  0xaa   :  { %518 = vmatprep.subr.bf16.mxu1 %v344_v41 }
  0xab   :  { %466 = vmatpush1.bf16.msra.mxu0 %v311_v37 }
  0xac   :  { %467 = vmatprep.subr.bf16.mxu0 %v314_v39 }
  0xad   :  { %519 = vmatpush1.bf16.msra.mxu1 %v343_v45 }
  0xae   :  { %855 = vmatprep.subr.bf16.mxu1 %v625_v42 }
  0xaf   :  { %468 = vmatpush1.bf16.msra.mxu0 %v313_v44 }
  0xb0   :  { %469 = vmatprep.subr.bf16.mxu0 %v316_v46  ;;  %537 = vmatmul.mubr.bf16.vlgmr.msra.gmra.mrb[8].mxu1 %v169_v49  ;;  %v559_v46 = vlaneseq  ;;  %v557_v49 = vld [vmem:[%s1326_s2] sm:$0x3] }
  0xb1   :  { %546 = vmatprep.mubr.bf16.mxu1 %v1079_v0  ;;  %v223_v0 = vld [vmem:[#allocation6 + $0x170] sm:$0xff]  ;;  %856 = vmatpush3.bf16.msra.mxu1 %v617_v43 }
  0xb2   :  { %v325_v25 = vunpack.c.l.s8.bf16 %v223_v0  ;;  %v327_v18 = vunpack.c.h.s8.bf16 %v223_v0  ;;  %857 = vmatprep.subr.bf16.mxu1 %v626_v51  ;;  %v560_v47 = vshrl.u32 %v559_v46, 7 }
  0xb3   :  { %470 = vmatpush1.bf16.msra.mxu0 %v315_v48 }
  0xb4   :  { %471 = vmatprep.subr.bf16.mxu0 %v318_v50  ;;  %v561_v48 = vsub.s32 0, %v560_v47  ;;  %v565_v50 = vsub.s32 1, %v560_v47 }
  0xb5   :  { %858 = vmatpush3.bf16.msra.mxu1 %v618_v60 }
  0xb6   :  { %859 = vmatprep.subr.bf16.mxu1 %v627_v9  ;;  %v562_v57 = vrot.slane %v557_v49, %v561_v48 }
  0xb7   :  { %472 = vmatpush1.bf16.msra.mxu0 %v317_v55  ;;  %v577_v55 = vld [vmem:[%s1327_s3] sm:$0x3] }
  0xb8   :  { %473 = vmatprep.subr.bf16.mxu0 %v320_v56  ;;  %547 = vmatmul.mubr.bf16.gmra.mrb[12].mxu1 %v176_v62 }
  0xbb   :  { %474 = vmatpush1.bf16.msra.mxu0 %v319_v61 }
  0xbc   :  { %475 = vmatprep.subr.bf16.mxu0 %v322_v5  ;;  %v566_v5 = vrot.slane %v557_v49, %v565_v50 }
  0xbf   :  { %476 = vmatpush1.bf16.msra.mxu0 %v321_v7 }
  0xc0   :  { %477 = vmatprep.subr.bf16.mxu0 %v324_v8  ;;  %v582_v8 = vrot.slane %v577_v55, %v561_v48 }
  0xc3   :  { %478 = vmatpush1.bf16.msra.mxu0 %v323_v17 }
  0xc4   :  { %479 = vmatprep.subr.bf16.mxu0 %v326_v24 }
  0xc7   :  { %480 = vmatpush1.bf16.msra.mxu0 %v325_v25  ;;  %v586_v25 = vrot.slane %v577_v55, %v565_v50  ;;  %v712_v50 = vld [vmem:[#allocation9 + $0x10] sm:$0xff] }
  0xc8   :  { %481 = vmatprep.subr.bf16.mxu0 %v328_v33 }
  0xcb   :  { %482 = vmatpush1.bf16.msra.mxu0 %v327_v18 }
  0xce   :  { %484 = vmatmul.mubr.bf16.vlgmr.msra.gmra.mrb[0].mxu0 %v138_v29  ;;  %v619_v29 = vunpack.c.l.s8.bf16 %v610_v10 }
  0xcf   :  { %493 = vmatprep.mubr.bf16.mxu0 %v146_v30  ;;  %v611_v30 = vld [vmem:[#allocation8 + $0x10] sm:$0xff] }
  0xd0   :  { %860 = vmatpush3.bf16.msra.mxu1 %v619_v29  ;;  %v622_v53 = vunpack.c.h.s8.bf16 %v611_v30 }
  0xd1   :  { %861 = vmatprep.subr.bf16.mxu1 %v628_v15 }
  0xd4   :  { %862 = vmatpush3.bf16.msra.mxu1 %v620_v16 }
  0xd5   :  { %863 = vmatprep.subr.bf16.mxu1 %v629_v23 }
  0xd6   :  { %494 = vmatmul.mubr.bf16.gmra.mrb[4].mxu0 %v145_v35  ;;  %v621_v35 = vunpack.c.l.s8.bf16 %v611_v30 }
  0xd8   :  { %864 = vmatpush3.bf16.msra.mxu1 %v621_v35 }
  0xd9   :  { %865 = vmatprep.subr.bf16.mxu1 %v630_v14 }
  0xdc   :  { %866 = vmatpush3.bf16.msra.mxu1 %v622_v53 }
  0xdd   :  { %867 = vmatprep.subr.bf16.mxu1 %v631_v1 }
  0xe0   :  { %868 = vmatpush3.bf16.msra.mxu1 %v623_v12 }
  0xe1   :  { %869 = vmatprep.subr.bf16.mxu1 %v632_v20 }
  0xe4   :  { %870 = vmatpush3.bf16.msra.mxu1 %v624_v26 }
  0xe5   :  { %893 = vmatprep.subr.bf16.mxu1 %v714_v4 }
 0x163   :  { %v379_v58 = vpop.f32.mrb[0].mxu1 }
 0x164   :  { %v381_v59 = vpop.f32.mrb[1].mxu1 }
 0x165   :  { %v383_v13 = vpop.f32.mrb[2].mxu1 }
 0x166   :  { %v385_v27 = vpop.f32.mrb[3].mxu1 }
 0x16b   :  { %v389_v28 = vpop.f32.mrb[4].mxu1 }
 0x16c   :  { %v391_v31 = vpop.f32.mrb[5].mxu1 }
 0x16d   :  { %v393_v32 = vpop.f32.mrb[6].mxu1 }
 0x16e   :  { %v395_v34 = vpop.f32.mrb[7].mxu1 }
 0x183   :  { %v538_v36 = vpop.f32.mrb[8].mxu1 }
 0x184   :  { %v540_v37 = vpop.f32.mrb[9].mxu1 }
 0x185   :  { %v542_v38 = vpop.f32.mrb[10].mxu1 }
 0x186   :  { %v544_v39 = vpop.f32.mrb[11].mxu1 }
 0x18b   :  { %v548_v40 = vpop.f32.mrb[12].mxu1 }
 0x18c   :  { %v550_v41 = vpop.f32.mrb[13].mxu1 }
 0x18d   :  { %v552_v44 = vpop.f32.mrb[14].mxu1 }
 0x18e   :  { %v554_v45 = vpop.f32.mrb[15].mxu1 }
 0x1a1   :  { %v485_v52 = vpop.f32.mrb[0].mxu0 }
 0x1a2   :  { %v913_v56 = vadd.f32 %v485_v52, %v379_v58  ;;  %v487_v61 = vpop.f32.mrb[1].mxu0  ;;  %v718_v52 = vunpack.c.l.s8.bf16 %v712_v50 }
 0x1a3   :  { %v915_v62 = vadd.f32 %v487_v61, %v381_v59  ;;  %v489_v6 = vpop.f32.mrb[2].mxu0 }
 0x1a4   :  { %v914_v7 = vadd.f32 %v913_v56, %v538_v36  ;;  %v917_v11 = vadd.f32 %v489_v6, %v383_v13  ;;  %v491_v17 = vpop.f32.mrb[3].mxu0 }
 0x1a5   :  { %v916_v24 = vadd.f32 %v915_v62, %v540_v37  ;;  %v919_v0 = vadd.f32 %v491_v17, %v385_v27  ;;  %v832_v62 = vld [vmem:[%s1329_s5] ss:$0 sm:$0xff] }
 0x1a6   :  { %v569_v33 = vmul.f32 %v914_v7, %v562_v57  ;;  %v918_v18 = vadd.f32 %v917_v11, %v542_v38  ;;  %v833_v7 = vld [vmem:[%s1330_s6] ss:$0 sm:$0xff] }
 0x1a7   :  { %v570_v19 = vmul.f32 %v916_v24, %v566_v5  ;;  %v920_v21 = vadd.f32 %v919_v0, %v544_v39  ;;  %v711_v39 = vld [vmem:[#allocation9 + $0x8] sm:$0xff] }
 0x1a8   :  { %v589_v42 = vadd.f32 %v582_v8, %v569_v33  ;;  %v571_v43 = vmul.f32 %v918_v18, %v562_v57  ;;  %v717_v49 = vunpack.c.h.s8.bf16 %v711_v39 }
 0x1a9   :  { %v572_v51 = vmul.f32 %v920_v21, %v566_v5  ;;  %v495_v60 = vpop.f32.mrb[4].mxu0  ;;  %v590_v63 = vadd.f32 %v586_v25, %v570_v19 }
 0x1aa   :  { %v591_v9 = vadd.f32 %v582_v8, %v571_v43  ;;  %v921_v10 = vadd.f32 %v495_v60, %v389_v28  ;;  %v497_v29 = vpop.f32.mrb[5].mxu0  ;;  %v597_v23 = vmax.f32 %v589_v42, 0.0 }
 0x1ab   :  { %v923_v15 = vadd.f32 %v497_v29, %v391_v31  ;;  %v499_v16 = vpop.f32.mrb[6].mxu0  ;;  %v592_v22 = vadd.f32 %v586_v25, %v572_v51  ;;  %v598_v2 = vmax.f32 %v590_v63, 0.0  ;;  %v715_v31 = vunpack.c.h.s8.bf16 %v1286_v3 }
 0x1ac   :  { %v599_v30 = vmax.f32 %v591_v9, 0.0  ;;  %v922_v35 = vadd.f32 %v921_v10, %v548_v40  ;;  %v925_v14 = vadd.f32 %v499_v16, %v393_v32  ;;  %v501_v53 = vpop.f32.mrb[7].mxu0  ;;  %v719_v3 = vunpack.c.h.s8.bf16 %v712_v50 }
 0x1ad   :  { %v924_v54 = vadd.f32 %v923_v15, %v550_v41  ;;  %v927_v1 = vadd.f32 %v501_v53, %v395_v34  ;;  %v600_v12 = vmax.f32 %v592_v22, 0.0 }
 0x1ae   :  { %v605_v20 = vpack.c.bf16 %v599_v30, %v597_v23  ;;  %v573_v26 = vmul.f32 %v922_v35, %v562_v57  ;;  %v926_v58 = vadd.f32 %v925_v14, %v552_v44  ;;  %v716_v44 = vunpack.c.l.s8.bf16 %v711_v39  ;;  %v834_v30 = vld [vmem:[%s1332_s8] ss:$0 sm:$0xff]  ;;  %s1039_s8 = scalar_lea.vmem %s819_s28, 256 }
 0x1af   :  { %v574_v59 = vmul.f32 %v924_v54, %v566_v5  ;;  %v928_v13 = vadd.f32 %v927_v1, %v554_v45  ;;  %v606_v27 = vpack.c.bf16 %v600_v12, %v598_v2  ;;  %v835_v54 = vld [vmem:[%s1333_s9] ss:$0 sm:$0xff]  ;;  %p1040_p4 = scmp.ne.s32.totalorder %s819_s28, %s1039_s8  ;;  %p1045_p6 = scmp.lt.s32.totalorder %s1039_s8, %s1039_s8 }
 0x1b0   :  { %v575_v28 = vmul.f32 %v926_v58, %v562_v57  ;;  %v593_v36 = vadd.f32 %v582_v8, %v573_v26 }
 0x1b1   :  { %v576_v37 = vmul.f32 %v928_v13, %v566_v5  ;;  %665 = vmatprep.mubr.bf16.mxu1 %v606_v27  ;;  %v594_v38 = vadd.f32 %v586_v25, %v574_v59  ;;  %p1046_p7 = por %p1045_p6, %p1044_p5 }
 0x1b2   :  { %666 = vmatmul.mubr.bf16.vlgmr.msra.gmra.mrb[16].mxu1 %v605_v20  ;;  %v595_v32 = vadd.f32 %v582_v8, %v575_v28  ;;  %v601_v34 = vmax.f32 %v593_v36, 0.0 }
 0x1b3   :  { %v596_v40 = vadd.f32 %v586_v25, %v576_v37  ;;  %894 = vmatpush3.bf16.msra.mxu1 %v714_v4  ;;  %v602_v45 = vmax.f32 %v594_v38, 0.0  ;;  %v713_v4 = vld [vmem:[#allocation9 + $0x18] sm:$0xff]  ;;  %p1047_p8 = pnand %p1046_p7, %p1040_p4 }
 0x1b4   :  { %v603_v41 = vmax.f32 %v595_v32, 0.0  ;;  %895 = vmatprep.subr.bf16.mxu1 %v715_v31  ;;  %v720_v55 = vunpack.c.l.s8.bf16 %v713_v4  ;;  %v721_v56 = vunpack.c.h.s8.bf16 %v713_v4 }
 0x1b5   :  { %v604_v46 = vmax.f32 %v596_v40, 0.0 }
 0x1b6   :  { %v607_v47 = vpack.c.bf16 %v603_v41, %v601_v34 }
 0x1b7   :  { %v608_v48 = vpack.c.bf16 %v604_v46, %v602_v45  ;;  %896 = vmatpush3.bf16.msra.mxu1 %v715_v31 }
 0x1b8   :  { %897 = vmatprep.subr.bf16.mxu1 %v716_v44 }
 0x1b9   :  { %673 = vmatprep.mubr.bf16.mxu1 %v608_v48 }
 0x1ba   :  { %674 = vmatmul.mubr.bf16.gmra.mrb[20].mxu1 %v607_v47 }
 0x1bb   :  { %898 = vmatpush3.bf16.msra.mxu1 %v716_v44 }
 0x1bc   :  { %899 = vmatprep.subr.bf16.mxu1 %v717_v49 }
 0x1bf   :  { %900 = vmatpush3.bf16.msra.mxu1 %v717_v49 }
 0x1c0   :  { %901 = vmatprep.subr.bf16.mxu1 %v718_v52 }
 0x1c3   :  { %902 = vmatpush3.bf16.msra.mxu1 %v718_v52 }
 0x1c4   :  { %903 = vmatprep.subr.bf16.mxu1 %v719_v3 }
 0x1c7   :  { %904 = vmatpush3.bf16.msra.mxu1 %v719_v3 }
 0x1c8   :  { %905 = vmatprep.subr.bf16.mxu1 %v720_v55 }
 0x1cb   :  { %906 = vmatpush3.bf16.msra.mxu1 %v720_v55 }
 0x1cc   :  { %907 = vmatprep.subr.bf16.mxu1 %v721_v56 }
 0x1cf   :  { %908 = vmatpush3.bf16.msra.mxu1 %v721_v56 }
 0x285   :  { %v871_v57 = vpop.f32.mrb[16].mxu1 }
 0x286   :  { %v872_v61 = vpop.f32.mrb[17].mxu1 }
 0x287   :  { %v873_v5 = vadd.f32 %v872_v61, %v871_v57  ;;  %v874_v6 = vpop.f32.mrb[18].mxu1 }
 0x288   :  { %v875_v8 = vpop.f32.mrb[19].mxu1 }
 0x289   :  { %v689_v11 = vmul.f32 %v873_v5, %v832_v62  ;;  %v876_v17 = vadd.f32 %v875_v8, %v874_v6 }
 0x28b   :  { %v700_v24 = vadd.f32 %v833_v7, %v689_v11  ;;  %v690_v0 = vmul.f32 %v876_v17, %v832_v62 }
 0x28d   :  { %v701_v25 = vadd.f32 %v833_v7, %v690_v0  ;;  %v877_v33 = vpop.f32.mrb[20].mxu1  ;;  %v704_v19 = vmax.f32 %v700_v24, 0.0 }
 0x28e   :  { %v878_v18 = vpop.f32.mrb[21].mxu1 }
 0x28f   :  { %v705_v21 = vmax.f32 %v701_v25, 0.0  ;;  %v879_v42 = vadd.f32 %v878_v18, %v877_v33  ;;  %v880_v43 = vpop.f32.mrb[22].mxu1 }
 0x290   :  { %v881_v51 = vpop.f32.mrb[23].mxu1 }
 0x291   :  { %v691_v60 = vmul.f32 %v879_v42, %v832_v62  ;;  %v882_v63 = vadd.f32 %v881_v51, %v880_v43  ;;  %v708_v9 = vpack.c.bf16 %v705_v21, %v704_v19 }
 0x293   :  { %v702_v10 = vadd.f32 %v833_v7, %v691_v60  ;;  %v692_v29 = vmul.f32 %v882_v63, %v832_v62  ;;  %909 = vmatprep.mubr.bf16.mxu1 %v708_v9 }
 0x295   :  { %v703_v15 = vadd.f32 %v833_v7, %v692_v29  ;;  %v706_v16 = vmax.f32 %v702_v10, 0.0 }
 0x297   :  { %v707_v22 = vmax.f32 %v703_v15, 0.0 }
 0x299   :  { %v709_v23 = vpack.c.bf16 %v707_v22, %v706_v16 }
 0x29b   :  { %910 = vmatmul.mubr.bf16.vlgmr.msra.gmra.mrb[24].mxu1 %v709_v23 }
 0x36e   :  { %v911_v35 = vpop.f32.mrb[24].mxu1 }
 0x36f   :  { %v780_v14 = vmul.f32 %v911_v35, %v834_v30  ;;  %v756_v53 = vpop.f32.mrb[25].mxu1 }
 0x370   :  { %v778_v1 = vmul.f32 %v834_v30, %v756_v53  ;;  %v912_v2 = vpop.f32.mrb[26].mxu1 }
 0x371   :  { %v781_v12 = vmul.f32 %v912_v2, %v834_v30  ;;  %v759_v20 = vpop.f32.mrb[27].mxu1  ;;  %v791_v58 = vadd.f32 %v835_v54, %v780_v14 }
 0x372   :  { %v779_v26 = vmul.f32 %v834_v30, %v759_v20  ;;  %v789_v13 = vadd.f32 %v835_v54, %v778_v1 }
 0x373   :  { %v792_v59 = vadd.f32 %v835_v54, %v781_v12 }
 0x374   :  { %v790_v27 = vadd.f32 %v835_v54, %v779_v26 }
 0x375   :  { %v852_v28 = vpack.c.bf16 %v792_v59, %v791_v58 }
 0x376   :  { %v847_v36 = vpack.c.bf16 %v790_v27, %v789_v13 }
 0x377   :  { %854 = vst [vmem:[#allocation11 + $0x8] sm:$0xff] %v852_v28  }
 0x378   :  { %848 = vst [vmem:[#allocation11] sm:$0xff] %v847_v36  }
 0x379   :  { %1050 = shalt.err (!%p1047_p8)
}
 0x37a   :  { %s1051_s12 = scalar_lea.hbm %s1334_s10, 256 }
 0x37b   :  { %p1052_p9 = scmp.ne.s32.totalorder %s1334_s10, %s1051_s12  ;;  %p1055_p10 = scmp.lt.u32.totalorder %s1051_s12, %s1334_s10 }
 0x37d   :  { %p1057_p11 = pnand %p1055_p10, %p1052_p9 }
 0x37f   :  { %1060 = shalt.err (!%p1057_p11)
}
 0x380   :  { %s1081_s1 = smov 64   ;;  %s1082_s14 = smov 4  }
 0x381   :  { %824 = dma.vmem_to_hbm [thread:$0]  %s819_s28, 256, %s1334_s10, [#allocation5], %s1081_s1, %s1081_s1, %s1082_s14  }
 0x382   :  { %1067 = dma.done.wait [#allocation5], 256  }
 0x383   :  { %1068 = vsyncadd [#allocation5], 4294967040 }
 0x384   :  { %828 = vsyncpa [#allocation4], 1 }
 0x385   :  { %829 = vsyncpa [#allocation7], 1 }
 0x386   :  { %830 = vsyncpa [#allocation10], 1 }
 0x387   :  { %831 = vsyncpa [#allocation5], 1 }

</bundles_post_ra>
